<compile_context>
chip_gen: v5e
topology: v5e:2x2
jax: 0.10.0
libtpu: 0.0.40
codegen_flags: <defaults>
</compile_context>

<pallas_src>
import functools

import jax
import jax.numpy as jnp
from jax.experimental import pallas as pl
from jax.experimental.pallas import tpu as pltpu

# ----- scaled-down hyperparameters (original: in_channels ~66, K=100) -------
C_IN = 16      # input channels
K_CH = 32      # per-conv output channels (orig 100); module output = 3*K_CH
BATCH = 2
LEN = 16       # sequence length


# ============================ fused Pallas kernel ============================

def _inception_kernel(x_ref, w1_ref, s1_ref, h1_ref, w3_ref, s3_ref, h3_ref,
                      o_ref, *, k_ch, seq_len):
    """Whole inception module, fully VMEM resident.

    x_ref : (M, Cin)          M = N*L (batch folded into matmul rows)
    w1_ref: (Cin, 3K)         the three 1x1 conv weights concatenated on Cout
    s1_ref, h1_ref: (1, 3K)   folded BN scale / shift for the 1x1 convs
    w3_ref: (4, 3K, K)        the four 3x3 conv weights in im2col form
    s3_ref, h3_ref: (4, 1, K) folded BN scale / shift for the 3x3 convs
    o_ref : (M, 3K)           [branch1 | branch2 | branch3]
    """
    m = x_ref.shape[0]
    x = x_ref[...]

    # --- 3 parallel 1x1 convs as ONE lane-dense matmul + BN + ReLU ----------
    y = jnp.dot(x, w1_ref[...], preferred_element_type=jnp.float32)
    y = jnp.maximum(y * s1_ref[...] + h1_ref[...], 0.0)            # (M, 3K)

    # per-sequence boundary masks (batch folded into rows -> row % L)
    row = jax.lax.broadcasted_iota(jnp.int32, (m, k_ch), 0) % seq_len
    first = row == 0
    last = row == seq_len - 1

    def conv3_bn_relu(h, idx):
        # zero-padded k=3 conv as a single im2col matmul + BN + ReLU
        h_prev = jnp.where(first, 0.0, pltpu.roll(h, shift=1, axis=0))
        h_next = jnp.where(last, 0.0, pltpu.roll(h, shift=m - 1, axis=0))
        xcat = jnp.concatenate([h_prev, h, h_next], axis=-1)       # (M, 3K)
        z = jnp.dot(xcat, w3_ref[idx], preferred_element_type=jnp.float32)
        return jnp.maximum(z * s3_ref[idx] + h3_ref[idx], 0.0)

    branch1 = y[:, :k_ch]
    branch2 = conv3_bn_relu(y[:, k_ch:2 * k_ch], 0)
    branch3 = y[:, 2 * k_ch:]
    for i in range(1, 4):
        branch3 = conv3_bn_relu(branch3, i)

    o_ref[...] = jnp.concatenate([branch1, branch2, branch3], axis=-1)


# =============================== jitted wrapper ==============================

def _pack_params(params):
    """Fold per-conv (w, bn_scale, bn_shift) into the fused-kernel layout."""
    w1 = jnp.concatenate([w[0] for (w, _, _) in params["c1"]], axis=-1)     # (Cin,3K)
    s1 = jnp.concatenate([s for (_, s, _) in params["c1"]]).reshape(1, -1)  # (1,3K)
    h1 = jnp.concatenate([h for (_, _, h) in params["c1"]]).reshape(1, -1)  # (1,3K)
    w3 = jnp.stack([w.reshape(-1, w.shape[-1])
                    for (w, _, _) in params["c3"]])                         # (4,3K,K)
    s3 = jnp.stack([s.reshape(1, -1) for (_, s, _) in params["c3"]])        # (4,1,K)
    h3 = jnp.stack([h.reshape(1, -1) for (_, _, h) in params["c3"]])        # (4,1,K)
    return w1, s1, h1, w3, s3, h3


@jax.jit
def inception_forward(params, x_ncl):
    """basic_inception_module forward.  x_ncl: (N, C_in, L) -> (N, 3K, L)."""
    n, c_in, l = x_ncl.shape
    w1, s1, h1, w3, s3, h3 = _pack_params(params)
    k_ch = w3.shape[-1]
    m = n * l
    x2d = jnp.transpose(x_ncl, (0, 2, 1)).reshape(m, c_in)        # (N*L, Cin)

    cost = pl.CostEstimate(
        flops=2 * m * c_in * 3 * k_ch + 4 * 2 * m * 3 * k_ch * k_ch,
        transcendentals=0,
        bytes_accessed=4 * (x2d.size + w1.size + w3.size + m * 3 * k_ch))

    out2d = pl.pallas_call(
        functools.partial(_inception_kernel, k_ch=k_ch, seq_len=l),
        out_shape=jax.ShapeDtypeStruct((m, 3 * k_ch), jnp.float32),
        cost_estimate=cost,
    )(x2d, w1, s1, h1, w3, s3, h3)

    # match torch.cat([...], dim=1): channels-first output (N, 3K, L)
    return jnp.transpose(out2d.reshape(n, l, 3 * k_ch), (0, 2, 1))


# ====================== parameter init (deterministic) =======================

def _init_conv(key, cin, cout, kk):
    """BasicConv1d params: conv weight (kk, Cin, Cout) + folded eval-mode BN."""
    kw, kg, kb, km, kv = jax.random.split(key, 5)
    w = jax.random.normal(kw, (kk, cin, cout), jnp.float32) * jnp.sqrt(2.0 / (kk * cin))
    gamma = 1.0 + 0.1 * jax.random.normal(kg, (cout,), jnp.float32)
    beta = 0.1 * jax.random.normal(kb, (cout,), jnp.float32)
    rmean = 0.1 * jax.random.normal(km, (cout,), jnp.float32)
    rvar = 0.5 + jnp.abs(jax.random.normal(kv, (cout,), jnp.float32))
    scale = gamma * jax.lax.rsqrt(rvar + 1e-3)                    # BN eps = 0.001
    shift = beta - rmean * scale
    return w, scale, shift


def init_inception(key, c_in, k_ch):
    keys = jax.random.split(key, 7)
    return {
        "c1": [_init_conv(keys[i], c_in, k_ch, 1) for i in range(3)],
        "c3": [_init_conv(keys[3 + i], k_ch, k_ch, 3) for i in range(4)],
    }


# ======================= pure-JAX reference (check) ==========================

def _ref_conv(x_nlc, w, scale, shift):
    kk = w.shape[0]
    pad = (kk - 1) // 2
    y = jax.lax.conv_general_dilated(
        x_nlc, w, window_strides=(1,), padding=[(pad, pad)],
        dimension_numbers=("NWC", "WIO", "NWC"),
        precision=jax.lax.Precision.HIGHEST)
    return jnp.maximum(y * scale + shift, 0.0)


def ref_forward(params, x_ncl):
    x = jnp.transpose(x_ncl, (0, 2, 1))                           # (N, L, C)
    c1, c3 = params["c1"], params["c3"]
    b1 = _ref_conv(x, *c1[0])
    b2 = _ref_conv(_ref_conv(x, *c1[1]), *c3[0])
    b3 = _ref_conv(x, *c1[2])
    for i in range(1, 4):
        b3 = _ref_conv(b3, *c3[i])
    out = jnp.concatenate([b1, b2, b3], axis=-1)                  # (N, L, 3K)
    return jnp.transpose(out, (0, 2, 1))                          # (N, 3K, L)


# =================================== main ====================================

if __name__ == "__main__":
    key = jax.random.PRNGKey(0)
    pkey, xkey = jax.random.split(key)
    params = init_inception(pkey, C_IN, K_CH)
    x = jax.random.normal(xkey, (BATCH, C_IN, LEN), jnp.float32)  # NCL like torch

    out = jax.block_until_ready(inception_forward(params, x))
    assert out.shape == (BATCH, 3 * K_CH, LEN), out.shape

    ref = ref_forward(params, x)
    max_err = float(jnp.max(jnp.abs(out - ref)))
    if not jnp.allclose(out, ref, rtol=5e-4, atol=5e-4):
        raise AssertionError(f"Pallas kernel mismatch, max_abs_err={max_err}")
    print("KERNEL_OK")
</pallas_src>

<mosaic_0001>
module attributes {stable_mosaic.version = 11 : i64} {
  func.func @_inception_kernel(%arg0: memref<32x16xf32, #tpu.memory_space<vmem>>, %arg1: memref<16x96xf32, #tpu.memory_space<vmem>>, %arg2: memref<1x96xf32, #tpu.memory_space<vmem>>, %arg3: memref<1x96xf32, #tpu.memory_space<vmem>>, %arg4: memref<4x96x32xf32, #tpu.memory_space<vmem>>, %arg5: memref<4x1x32xf32, #tpu.memory_space<vmem>>, %arg6: memref<4x1x32xf32, #tpu.memory_space<vmem>>, %arg7: memref<32x96xf32, #tpu.memory_space<vmem>>) attributes {dimension_semantics = [], scalar_prefetch = 0 : i64, scratch_operands = 0 : i64, tpu.core_type = #tpu.core_type<tc>} {
    %c0 = arith.constant 0 : index
    %c0_0 = arith.constant 0 : index
    %0 = vector.load %arg0[%c0, %c0_0] : memref<32x16xf32, #tpu.memory_space<vmem>>, vector<32x16xf32>
    %c0_1 = arith.constant 0 : index
    %c0_2 = arith.constant 0 : index
    %1 = vector.load %arg1[%c0_1, %c0_2] : memref<16x96xf32, #tpu.memory_space<vmem>>, vector<16x96xf32>
    %cst = arith.constant dense<0.000000e+00> : vector<32x96xf32>
    %2 = tpu.matmul %0, %1, %cst {dimension_numbers = #tpu.dot_dimension_numbers<[1], [0], [0], [1], [0, 0, 1, 1], [], []>} : vector<32x16xf32>, vector<16x96xf32>, vector<32x96xf32> -> vector<32x96xf32>
    %c0_3 = arith.constant 0 : index
    %c0_4 = arith.constant 0 : index
    %3 = vector.load %arg2[%c0_3, %c0_4] : memref<1x96xf32, #tpu.memory_space<vmem>>, vector<1x96xf32>
    %4 = vector.broadcast %3 : vector<1x96xf32> to vector<32x96xf32>
    %5 = arith.mulf %2, %4 : vector<32x96xf32>
    %c0_5 = arith.constant 0 : index
    %c0_6 = arith.constant 0 : index
    %6 = vector.load %arg3[%c0_5, %c0_6] : memref<1x96xf32, #tpu.memory_space<vmem>>, vector<1x96xf32>
    %7 = vector.broadcast %6 : vector<1x96xf32> to vector<32x96xf32>
    %8 = arith.addf %5, %7 : vector<32x96xf32>
    %cst_7 = arith.constant 0.000000e+00 : f32
    %9 = vector.broadcast %cst_7 : f32 to vector<32x96xf32>
    %10 = arith.maximumf %8, %9 : vector<32x96xf32>
    %11 = tpu.iota {dimensions = array<i32: 0>} : vector<32x32xi32>
    %c16_i32 = arith.constant 16 : i32
    %c0_i32 = arith.constant 0 : i32
    %12 = arith.cmpi eq, %c16_i32, %c0_i32 : i32
    %c1_i32 = arith.constant 1 : i32
    %13 = arith.select %12, %c1_i32, %c16_i32 : i32
    %14 = vector.broadcast %13 : i32 to vector<32x32xi32>
    %15 = arith.remsi %11, %14 : vector<32x32xi32>
    %c0_i32_8 = arith.constant 0 : i32
    %16 = vector.broadcast %c0_i32_8 : i32 to vector<32x32xi32>
    %17 = arith.cmpi ne, %15, %16 : vector<32x32xi32>
    %c0_i32_9 = arith.constant 0 : i32
    %18 = vector.broadcast %c0_i32_9 : i32 to vector<32x32xi32>
    %19 = arith.cmpi slt, %15, %18 : vector<32x32xi32>
    %c0_i32_10 = arith.constant 0 : i32
    %20 = arith.cmpi slt, %13, %c0_i32_10 : i32
    %21 = vector.broadcast %20 : i1 to vector<32x32xi1>
    %22 = vector.broadcast %21 : vector<32x32xi1> to vector<32x32xi1>
    %23 = arith.xori %19, %22 : vector<32x32xi1>
    %24 = arith.andi %23, %17 : vector<32x32xi1>
    %25 = vector.broadcast %13 : i32 to vector<32x32xi32>
    %26 = arith.addi %15, %25 : vector<32x32xi32>
    %27 = arith.select %24, %26, %15 : vector<32x32xi1>, vector<32x32xi32>
    %c0_i32_11 = arith.constant 0 : i32
    %28 = vector.broadcast %c0_i32_11 : i32 to vector<32x32xi32>
    %29 = arith.cmpi eq, %27, %28 : vector<32x32xi32>
    %c15_i32 = arith.constant 15 : i32
    %30 = vector.broadcast %c15_i32 : i32 to vector<32x32xi32>
    %31 = arith.cmpi eq, %27, %30 : vector<32x32xi32>
    %32 = vector.extract_strided_slice %10 {offsets = [0, 0], sizes = [32, 32], strides = [1, 1]} : vector<32x96xf32> to vector<32x32xf32>
    %33 = vector.extract_strided_slice %10 {offsets = [0, 32], sizes = [32, 32], strides = [1, 1]} : vector<32x96xf32> to vector<32x32xf32>
    %c1_i32_12 = arith.constant 1 : i32
    %34 = tpu.dynamic_rotate %33 by %c1_i32_12 dim 0 : vector<32x32xf32>, i32 -> vector<32x32xf32>
    %cst_13 = arith.constant 0.000000e+00 : f32
    %35 = vector.broadcast %cst_13 : f32 to vector<32x32xf32>
    %36 = arith.select %29, %35, %34 : vector<32x32xi1>, vector<32x32xf32>
    %c31_i32 = arith.constant 31 : i32
    %37 = tpu.dynamic_rotate %33 by %c31_i32 dim 0 : vector<32x32xf32>, i32 -> vector<32x32xf32>
    %cst_14 = arith.constant 0.000000e+00 : f32
    %38 = vector.broadcast %cst_14 : f32 to vector<32x32xf32>
    %39 = arith.select %31, %38, %37 : vector<32x32xi1>, vector<32x32xf32>
    %40 = tpu.concatenate %36, %33, %39 in 1 : vector<32x32xf32>, vector<32x32xf32>, vector<32x32xf32> -> vector<32x96xf32>
    %c0_15 = arith.constant 0 : index
    %c0_16 = arith.constant 0 : index
    %c0_17 = arith.constant 0 : index
    %41 = vector.load %arg4[%c0_15, %c0_16, %c0_17] : memref<4x96x32xf32, #tpu.memory_space<vmem>>, vector<1x96x32xf32>
    %42 = vector.shape_cast %41 : vector<1x96x32xf32> to vector<96x32xf32>
    %cst_18 = arith.constant dense<0.000000e+00> : vector<32x32xf32>
    %43 = tpu.matmul %40, %42, %cst_18 {dimension_numbers = #tpu.dot_dimension_numbers<[1], [0], [0], [1], [0, 0, 1, 1], [], []>} : vector<32x96xf32>, vector<96x32xf32>, vector<32x32xf32> -> vector<32x32xf32>
    %c0_19 = arith.constant 0 : index
    %c0_20 = arith.constant 0 : index
    %c0_21 = arith.constant 0 : index
    %44 = vector.load %arg5[%c0_19, %c0_20, %c0_21] : memref<4x1x32xf32, #tpu.memory_space<vmem>>, vector<1x1x32xf32>
    %45 = vector.shape_cast %44 : vector<1x1x32xf32> to vector<1x32xf32>
    %46 = vector.broadcast %45 : vector<1x32xf32> to vector<32x32xf32>
    %47 = arith.mulf %43, %46 : vector<32x32xf32>
    %c0_22 = arith.constant 0 : index
    %c0_23 = arith.constant 0 : index
    %c0_24 = arith.constant 0 : index
    %48 = vector.load %arg6[%c0_22, %c0_23, %c0_24] : memref<4x1x32xf32, #tpu.memory_space<vmem>>, vector<1x1x32xf32>
    %49 = vector.shape_cast %48 : vector<1x1x32xf32> to vector<1x32xf32>
    %50 = vector.broadcast %49 : vector<1x32xf32> to vector<32x32xf32>
    %51 = arith.addf %47, %50 : vector<32x32xf32>
    %cst_25 = arith.constant 0.000000e+00 : f32
    %52 = vector.broadcast %cst_25 : f32 to vector<32x32xf32>
    %53 = arith.maximumf %51, %52 : vector<32x32xf32>
    %54 = vector.extract_strided_slice %10 {offsets = [0, 64], sizes = [32, 32], strides = [1, 1]} : vector<32x96xf32> to vector<32x32xf32>
    %c1_i32_26 = arith.constant 1 : i32
    %55 = tpu.dynamic_rotate %54 by %c1_i32_26 dim 0 : vector<32x32xf32>, i32 -> vector<32x32xf32>
    %cst_27 = arith.constant 0.000000e+00 : f32
    %56 = vector.broadcast %cst_27 : f32 to vector<32x32xf32>
    %57 = arith.select %29, %56, %55 : vector<32x32xi1>, vector<32x32xf32>
    %c31_i32_28 = arith.constant 31 : i32
    %58 = tpu.dynamic_rotate %54 by %c31_i32_28 dim 0 : vector<32x32xf32>, i32 -> vector<32x32xf32>
    %cst_29 = arith.constant 0.000000e+00 : f32
    %59 = vector.broadcast %cst_29 : f32 to vector<32x32xf32>
    %60 = arith.select %31, %59, %58 : vector<32x32xi1>, vector<32x32xf32>
    %61 = tpu.concatenate %57, %54, %60 in 1 : vector<32x32xf32>, vector<32x32xf32>, vector<32x32xf32> -> vector<32x96xf32>
    %c1 = arith.constant 1 : index
    %c0_30 = arith.constant 0 : index
    %c0_31 = arith.constant 0 : index
    %62 = vector.load %arg4[%c1, %c0_30, %c0_31] : memref<4x96x32xf32, #tpu.memory_space<vmem>>, vector<1x96x32xf32>
    %63 = vector.shape_cast %62 : vector<1x96x32xf32> to vector<96x32xf32>
    %cst_32 = arith.constant dense<0.000000e+00> : vector<32x32xf32>
    %64 = tpu.matmul %61, %63, %cst_32 {dimension_numbers = #tpu.dot_dimension_numbers<[1], [0], [0], [1], [0, 0, 1, 1], [], []>} : vector<32x96xf32>, vector<96x32xf32>, vector<32x32xf32> -> vector<32x32xf32>
    %c1_33 = arith.constant 1 : index
    %c0_34 = arith.constant 0 : index
    %c0_35 = arith.constant 0 : index
    %65 = vector.load %arg5[%c1_33, %c0_34, %c0_35] : memref<4x1x32xf32, #tpu.memory_space<vmem>>, vector<1x1x32xf32>
    %66 = vector.shape_cast %65 : vector<1x1x32xf32> to vector<1x32xf32>
    %67 = vector.broadcast %66 : vector<1x32xf32> to vector<32x32xf32>
    %68 = arith.mulf %64, %67 : vector<32x32xf32>
    %c1_36 = arith.constant 1 : index
    %c0_37 = arith.constant 0 : index
    %c0_38 = arith.constant 0 : index
    %69 = vector.load %arg6[%c1_36, %c0_37, %c0_38] : memref<4x1x32xf32, #tpu.memory_space<vmem>>, vector<1x1x32xf32>
    %70 = vector.shape_cast %69 : vector<1x1x32xf32> to vector<1x32xf32>
    %71 = vector.broadcast %70 : vector<1x32xf32> to vector<32x32xf32>
    %72 = arith.addf %68, %71 : vector<32x32xf32>
    %cst_39 = arith.constant 0.000000e+00 : f32
    %73 = vector.broadcast %cst_39 : f32 to vector<32x32xf32>
    %74 = arith.maximumf %72, %73 : vector<32x32xf32>
    %c1_i32_40 = arith.constant 1 : i32
    %75 = tpu.dynamic_rotate %74 by %c1_i32_40 dim 0 : vector<32x32xf32>, i32 -> vector<32x32xf32>
    %cst_41 = arith.constant 0.000000e+00 : f32
    %76 = vector.broadcast %cst_41 : f32 to vector<32x32xf32>
    %77 = arith.select %29, %76, %75 : vector<32x32xi1>, vector<32x32xf32>
    %c31_i32_42 = arith.constant 31 : i32
    %78 = tpu.dynamic_rotate %74 by %c31_i32_42 dim 0 : vector<32x32xf32>, i32 -> vector<32x32xf32>
    %cst_43 = arith.constant 0.000000e+00 : f32
    %79 = vector.broadcast %cst_43 : f32 to vector<32x32xf32>
    %80 = arith.select %31, %79, %78 : vector<32x32xi1>, vector<32x32xf32>
    %81 = tpu.concatenate %77, %74, %80 in 1 : vector<32x32xf32>, vector<32x32xf32>, vector<32x32xf32> -> vector<32x96xf32>
    %c2 = arith.constant 2 : index
    %c0_44 = arith.constant 0 : index
    %c0_45 = arith.constant 0 : index
    %82 = vector.load %arg4[%c2, %c0_44, %c0_45] : memref<4x96x32xf32, #tpu.memory_space<vmem>>, vector<1x96x32xf32>
    %83 = vector.shape_cast %82 : vector<1x96x32xf32> to vector<96x32xf32>
    %cst_46 = arith.constant dense<0.000000e+00> : vector<32x32xf32>
    %84 = tpu.matmul %81, %83, %cst_46 {dimension_numbers = #tpu.dot_dimension_numbers<[1], [0], [0], [1], [0, 0, 1, 1], [], []>} : vector<32x96xf32>, vector<96x32xf32>, vector<32x32xf32> -> vector<32x32xf32>
    %c2_47 = arith.constant 2 : index
    %c0_48 = arith.constant 0 : index
    %c0_49 = arith.constant 0 : index
    %85 = vector.load %arg5[%c2_47, %c0_48, %c0_49] : memref<4x1x32xf32, #tpu.memory_space<vmem>>, vector<1x1x32xf32>
    %86 = vector.shape_cast %85 : vector<1x1x32xf32> to vector<1x32xf32>
    %87 = vector.broadcast %86 : vector<1x32xf32> to vector<32x32xf32>
    %88 = arith.mulf %84, %87 : vector<32x32xf32>
    %c2_50 = arith.constant 2 : index
    %c0_51 = arith.constant 0 : index
    %c0_52 = arith.constant 0 : index
    %89 = vector.load %arg6[%c2_50, %c0_51, %c0_52] : memref<4x1x32xf32, #tpu.memory_space<vmem>>, vector<1x1x32xf32>
    %90 = vector.shape_cast %89 : vector<1x1x32xf32> to vector<1x32xf32>
    %91 = vector.broadcast %90 : vector<1x32xf32> to vector<32x32xf32>
    %92 = arith.addf %88, %91 : vector<32x32xf32>
    %cst_53 = arith.constant 0.000000e+00 : f32
    %93 = vector.broadcast %cst_53 : f32 to vector<32x32xf32>
    %94 = arith.maximumf %92, %93 : vector<32x32xf32>
    %c1_i32_54 = arith.constant 1 : i32
    %95 = tpu.dynamic_rotate %94 by %c1_i32_54 dim 0 : vector<32x32xf32>, i32 -> vector<32x32xf32>
    %cst_55 = arith.constant 0.000000e+00 : f32
    %96 = vector.broadcast %cst_55 : f32 to vector<32x32xf32>
    %97 = arith.select %29, %96, %95 : vector<32x32xi1>, vector<32x32xf32>
    %c31_i32_56 = arith.constant 31 : i32
    %98 = tpu.dynamic_rotate %94 by %c31_i32_56 dim 0 : vector<32x32xf32>, i32 -> vector<32x32xf32>
    %cst_57 = arith.constant 0.000000e+00 : f32
    %99 = vector.broadcast %cst_57 : f32 to vector<32x32xf32>
    %100 = arith.select %31, %99, %98 : vector<32x32xi1>, vector<32x32xf32>
    %101 = tpu.concatenate %97, %94, %100 in 1 : vector<32x32xf32>, vector<32x32xf32>, vector<32x32xf32> -> vector<32x96xf32>
    %c3 = arith.constant 3 : index
    %c0_58 = arith.constant 0 : index
    %c0_59 = arith.constant 0 : index
    %102 = vector.load %arg4[%c3, %c0_58, %c0_59] : memref<4x96x32xf32, #tpu.memory_space<vmem>>, vector<1x96x32xf32>
    %103 = vector.shape_cast %102 : vector<1x96x32xf32> to vector<96x32xf32>
    %cst_60 = arith.constant dense<0.000000e+00> : vector<32x32xf32>
    %104 = tpu.matmul %101, %103, %cst_60 {dimension_numbers = #tpu.dot_dimension_numbers<[1], [0], [0], [1], [0, 0, 1, 1], [], []>} : vector<32x96xf32>, vector<96x32xf32>, vector<32x32xf32> -> vector<32x32xf32>
    %c3_61 = arith.constant 3 : index
    %c0_62 = arith.constant 0 : index
    %c0_63 = arith.constant 0 : index
    %105 = vector.load %arg5[%c3_61, %c0_62, %c0_63] : memref<4x1x32xf32, #tpu.memory_space<vmem>>, vector<1x1x32xf32>
    %106 = vector.shape_cast %105 : vector<1x1x32xf32> to vector<1x32xf32>
    %107 = vector.broadcast %106 : vector<1x32xf32> to vector<32x32xf32>
    %108 = arith.mulf %104, %107 : vector<32x32xf32>
    %c3_64 = arith.constant 3 : index
    %c0_65 = arith.constant 0 : index
    %c0_66 = arith.constant 0 : index
    %109 = vector.load %arg6[%c3_64, %c0_65, %c0_66] : memref<4x1x32xf32, #tpu.memory_space<vmem>>, vector<1x1x32xf32>
    %110 = vector.shape_cast %109 : vector<1x1x32xf32> to vector<1x32xf32>
    %111 = vector.broadcast %110 : vector<1x32xf32> to vector<32x32xf32>
    %112 = arith.addf %108, %111 : vector<32x32xf32>
    %cst_67 = arith.constant 0.000000e+00 : f32
    %113 = vector.broadcast %cst_67 : f32 to vector<32x32xf32>
    %114 = arith.maximumf %112, %113 : vector<32x32xf32>
    %115 = tpu.concatenate %32, %53, %114 in 1 : vector<32x32xf32>, vector<32x32xf32>, vector<32x32xf32> -> vector<32x96xf32>
    %c0_68 = arith.constant 0 : index
    %c0_69 = arith.constant 0 : index
    %116 = vector.load %arg7[%c0_68, %c0_69] : memref<32x96xf32, #tpu.memory_space<vmem>>, vector<32x96xf32>
    tpu.vector_store %arg7[%c0_68, %c0_69], %115 {strides = array<i32>} : memref<32x96xf32, #tpu.memory_space<vmem>>, vector<32x96xf32>,
    return
  }
}

</mosaic_0001>

<bundles_post_ra>
// kernel: inception_forward.1
= control target key start
LH: loop header
LB: loop body
LE: loop exit
PB: predicated region body
PF: predicated region fallthrough
CT: control target
= control target key end

     0   :  { %vm33_vm0 = vcmask 130048   ;;  %s1402_s0 = inlined_call_operand.vmem [shape: f32[32,16], index: 0, kind: input, shape index: {}]   ;;  %s1403_s1 = inlined_call_operand.vmem [shape: f32[16,96], index: 1, kind: input, shape index: {}]   ;;  %s1404_s2 = inlined_call_operand.vmem [shape: f32[1,96], index: 2, kind: input, shape index: {}]   ;;  %s1405_s3 = inlined_call_operand.vmem [shape: f32[1,96], index: 3, kind: input, shape index: {}]   ;;  %s1406_s4 = inlined_call_operand.vmem [shape: f32[4,96,32], index: 4, kind: input, shape index: {}]   ;;  %s1407_s5 = inlined_call_operand.vmem [shape: f32[4,1,32], index: 5, kind: input, shape index: {}]   ;;  %s1408_s6 = inlined_call_operand.vmem [shape: f32[4,1,32], index: 6, kind: input, shape index: {}]   ;;  %s1409_s7 = inlined_call_operand.hbm [shape: f32[32,96], index: 7, kind: output, shape index: {}]  }
   0x1   :  { %v32_v0 = vld [vmem:[%s1403_s1 + $0x8] sm:$0xff]  ;;  %v31_v1 = vld [vmem:[%s1403_s1] sm:$0xff]  ;;  %v30_v3 = vld [vmem:[%s1402_s0 + $0x18] sm:$0xff] }
   0x2   :  { %60 = vmatpush.msra.mxu0 %v32_v0  ;;  %v27_v2 = vld [vmem:[%s1402_s0] sm:$0xff]  ;;  %838 = vmatpush.msra.mxu1 %v32_v0 }
   0x4   :  { %61 = vmatpush.msra.mxu0 %v31_v1  ;;  %839 = vmatpush.msra.mxu1 %v31_v1 }
   0x5   :  { %776 = vmatmul.msk.f32.vlgmr.msra.gmra.mxu0 %vm33_vm0, %v27_v2  ;;  %779 = vmatmul.msk.f32.vlgmr.msra.gmra.mxu1 %vm33_vm0, %v30_v3 }
   0x6   :  { %12 = vsyncpa [#allocation3], 0  ;;  %v28_v4 = vld [vmem:[%s1402_s0 + $0x8] sm:$0xff]  ;;  %v29_v5 = vld [vmem:[%s1402_s0 + $0x10] sm:$0xff]  ;;  %s882_s16 = smov 96   ;;  %s883_s17 = smov 64   ;;  %v95_v27 = vlaneseq }
   0x7   :  { %v846_v6 = vld [vmem:[%s1404_s2] ss:$0 sm:$0xff]  ;;  %v795_v24 = vld [vmem:[%s1406_s4 + $0xb8] sm:$0xff]  ;;  %v794_v25 = vld [vmem:[%s1406_s4 + $0xb0] sm:$0xff]  ;;  %vm219_vm6 = vcmask 523264   ;;  %vm214_vm7 = vcmask 261120  }
   0x8   :  { %v847_v7 = vld [vmem:[%s1405_s3] ss:$0 sm:$0xff]  ;;  %387 = vmatpush.msra.mxu2 %v795_v24  ;;  %v793_v28 = vld [vmem:[%s1406_s4 + $0xa8] sm:$0xff]  ;;  %v984_v30 = vshrl.u32 %v95_v27, 7  ;;  %v791_v31 = vld [vmem:[%s1406_s4 + $0x98] sm:$0xff]  ;;  %vm236_vm8 = vcmask 785408  }
   0x9   :  { %v792_v29 = vld [vmem:[%s1406_s4 + $0xa0] sm:$0xff]  ;;  %v790_v32 = vld [vmem:[%s1406_s4 + $0x90] sm:$0xff]  ;;  %v789_v34 = vld [vmem:[%s1406_s4 + $0x88] sm:$0xff]  ;;  %s884_s3 = smov 32   ;;  %s764_s26 = sshll.u32 %s1409_s7, 4  ;;  %s765_s26 = int_to_ptr.hbm [resolvable:$true] %s764_s26 }
   0xa   :  { %388 = vmatpush.msra.mxu2 %v794_v25  ;;  %vm189_vm1 = vcmp.lt.s32.totalorder %v984_v30, 7  ;;  %vm176_vm2 = vcmp.lt.s32.totalorder %v984_v30, 1  ;;  %v97_v39 = vadd.s32 8, %v984_v30  ;;  %v788_v40 = vld [vmem:[%s1406_s4 + $0x80] sm:$0xff]  ;;  %v787_v43 = vld [vmem:[%s1406_s4 + $0x78] sm:$0xff]  ;;  %v786_v45 = vld [vmem:[%s1406_s4 + $0x70] sm:$0xff] }
   0xb   :  { %v785_v47 = vld [vmem:[%s1406_s4 + $0x68] sm:$0xff]  ;;  %v99_v49 = vadd.s32 24, %v984_v30  ;;  %v784_v62 = vld [vmem:[%s1406_s4 + $0x60] sm:$0xff]  ;;  %v104_v0 = vand.u32 15, %v984_v30  ;;  %s886_s27 = smov 128   ;;  %s887_s28 = smov 8  }
   0xc   :  { %389 = vmatpush.msra.mxu2 %v793_v28  ;;  %v111_v44 = vand.u32 15, %v97_v39  ;;  %v828_v58 = vld [vmem:[%s1406_s4 + $0x160] sm:$0xff] }
   0xd   :  { %777 = vmatmul.msk.f32.gmra.mxu0 %vm33_vm0, %v28_v4  ;;  %v125_v55 = vand.u32 15, %v99_v49  ;;  %vm1051_vm5 = vcmp.eq.s32.totalorder %v104_v0, 0 }
   0xe   :  { %390 = vmatpush.msra.mxu2 %v792_v29  ;;  %vm1016_vm3 = vcmp.eq.s32.totalorder %v111_v44, 15  ;;  %v848_v29 = vld [vmem:[%s1407_s5 + $0x1] ss:$0 sm:$0xff] }
   0xf   :  { %vm1029_vm4 = vcmp.eq.s32.totalorder %v125_v55, 15 }
  0x10   :  { %391 = vmatpush.msra.mxu2 %v791_v31  ;;  %v849_v31 = vld [vmem:[%s1408_s6 + $0x1] ss:$0 sm:$0xff] }
  0x12   :  { %392 = vmatpush.msra.mxu2 %v790_v32 }
  0x14   :  { %393 = vmatpush.msra.mxu2 %v789_v34 }
  0x15   :  { %778 = vmatmul.msk.f32.gmra.mxu0 %vm33_vm0, %v29_v5 }
  0x16   :  { %394 = vmatpush.msra.mxu2 %v788_v40 }
  0x18   :  { %395 = vmatpush.msra.mxu2 %v787_v43 }
  0x1a   :  { %396 = vmatpush.msra.mxu2 %v786_v45 }
  0x1c   :  { %397 = vmatpush.msra.mxu2 %v785_v47 }
  0x1e   :  { %398 = vmatpush.msra.mxu2 %v784_v62 }
  0x82   :  { %v63_v8 = vpop.f32.mrf.mxu0  ;;  %v72_v17 = vpop.f32.mrf.mxu1 }
  0x83   :  { %v79_v9 = vmul.f32 %v846_v6, %v63_v8  ;;  %v82_v20 = vmul.f32 %v846_v6, %v72_v17  ;;  %v98_v8 = vadd.s32 16, %v984_v30  ;;  %v829_v30 = vld [vmem:[%s1406_s4 + $0x168] sm:$0xff] }
  0x85   :  { %v87_v10 = vadd.f32 %v847_v7, %v79_v9  ;;  %v90_v22 = vadd.f32 %v847_v7, %v82_v20 }
  0x87   :  { %v952_v11 = vmax.f32 %v87_v10, 0.0  ;;  %v968_v23 = vmax.f32 %v90_v22, 0.0  ;;  %v118_v10 = vand.u32 15, %v98_v8 }
  0x89   :  { %160 = vrot.lane.b32.xlu2 %v952_v11, %s882_s16  ;;  %298 = vrot.lane.b32.xlu0 %v952_v11, %s883_s17  ;;  %vm1067_vm9 = vcmp.eq.s32.totalorder %v118_v10, 0 }
  0x8a   :  { %v66_v12 = vpop.f32.mrf.mxu0 }
  0x8b   :  { %v80_v13 = vmul.f32 %v846_v6, %v66_v12 }
  0x8d   :  { %v88_v14 = vadd.f32 %v847_v7, %v80_v13 }
  0x8f   :  { %v958_v15 = vmax.f32 %v88_v14, 0.0 }
  0x91   :  { %300 = vrot.lane.b32.xlu0 %v958_v15, %s883_s17 }
  0x92   :  { %v69_v16 = vpop.f32.mrf.mxu0 }
  0x93   :  { %v81_v18 = vmul.f32 %v846_v6, %v69_v16  ;;  %v854_v16 = vld [vmem:[%s1407_s5 + $0x3] ss:$0 sm:$0xff] }
  0x95   :  { %v89_v19 = vadd.f32 %v847_v7, %v81_v18 }
  0x97   :  { %v962_v21 = vmax.f32 %v89_v19, 0.0 }
  0x99   :  { %162 = vrot.lane.b32.xlu0 %v958_v15, %s882_s16  ;;  %302 = vrot.lane.b32.xlu1 %v962_v21, %s883_s17 }
  0xa1   :  { %304 = vrot.lane.b32.xlu1 %v968_v23, %s883_s17 }
  0xe3   :  { %v1047_v1 = vpop.permute.xlu2 %160 }
  0xfb   :  { %v299_v26 = vpop.permute.xlu0 %298 }
  0xfc   :  { %v310_v35 = vrot.slane %v299_v26, 7  ;;  %v322_v36 = vrot.slane %v299_v26, 1 }
 0x103   :  { %v301_v33 = vpop.permute.xlu0 %300 }
 0x104   :  { %v311_v37 = vrot.slane %v301_v33, 7  ;;  %v323_v38 = vrot.slane %v301_v33, 1 }
 0x106   :  { %v328_v41 = vsel %vm189_vm1, %v322_v36, %v323_v38  ;;  %v316_v42 = vsel %vm176_vm2, %v310_v35, %v311_v37 }
 0x107   :  { %338 = vrot.lane.b32.xlu2 %v328_v41, %s883_s17 }
 0x10b   :  { %v303_v46 = vpop.permute.xlu1 %302  ;;  %v1062_v9 = vpop.permute.xlu0 %162 }
 0x10c   :  { %v312_v48 = vrot.slane %v303_v46, 7  ;;  %v324_v50 = vrot.slane %v303_v46, 1  ;;  %v351_v12 = vsel %vm214_vm7, %v316_v42, %v1062_v9 }
 0x10e   :  { %v315_v52 = vsel %vm176_vm2, %v311_v37, %v312_v48  ;;  %v327_v53 = vsel %vm189_vm1, %v323_v38, %v324_v50 }
 0x10f   :  { %164 = vrot.lane.b32.xlu2 %v962_v21, %s882_s16  ;;  %v331_v54 = vsel %vm1016_vm3, 0.0, %v327_v53  ;;  %v320_v18 = vsel %vm1067_vm9, 0.0, %v315_v52 }
 0x110   :  { %340 = vrot.lane.b32.xlu1 %v331_v54, %s883_s17 }
 0x113   :  { %v305_v56 = vpop.permute.xlu1 %304 }
 0x114   :  { %v325_v57 = vrot.slane %v305_v56, 1  ;;  %v313_v63 = vrot.slane %v305_v56, 7 }
 0x116   :  { %v326_v59 = vsel %vm189_vm1, %v324_v50, %v325_v57  ;;  %v329_v60 = vsel %vm189_vm1, %v325_v57, %v322_v36  ;;  %v317_v2 = vsel %vm176_vm2, %v313_v63, %v310_v35  ;;  %v314_v25 = vsel %vm176_vm2, %v312_v48, %v313_v63 }
 0x117   :  { %342 = vrot.lane.b32.xlu0 %v326_v59, %s883_s17  ;;  %v333_v61 = vsel %vm1029_vm4, 0.0, %v329_v60  ;;  %v318_v4 = vsel %vm1051_vm5, 0.0, %v317_v2 }
 0x118   :  { %344 = vrot.lane.b32.xlu2 %v333_v61, %s883_s17  ;;  %166 = vrot.lane.b32.xlu1 %v968_v23, %s882_s16  ;;  %v350_v6 = vsel %vm214_vm7, %v318_v4, %v1047_v1 }
 0x161   :  { %v339_v5 = vpop.permute.xlu2 %338 }
 0x162   :  { %v354_v7 = vsel %vm219_vm6, %v350_v6, %v339_v5  ;;  %v186_v6 = vrot.slane %v1062_v9, 1 }
 0x163   :  { %796 = vmatmul.msk.f32.vlgmr.msra.gmra.mxu2 %vm236_vm8, %v354_v7  ;;  %v185_v7 = vrot.slane %v1047_v1, 1 }
 0x165   :  { %v192_v8 = vsel %vm189_vm1, %v185_v7, %v186_v6 }
 0x169   :  { %v1072_v17 = vpop.permute.xlu2 %164 }
 0x16a   :  { %v352_v19 = vsel %vm214_vm7, %v320_v18, %v1072_v17  ;;  %v187_v10 = vrot.slane %v1072_v17, 1 }
 0x172   :  { %v345_v27 = vpop.permute.xlu2 %344 }
 0x182   :  { %v341_v13 = vpop.permute.xlu1 %340 }
 0x183   :  { %v355_v14 = vsel %vm219_vm6, %v351_v12, %v341_v13  ;;  %v191_v12 = vsel %vm189_vm1, %v186_v6, %v187_v10  ;;  %v174_v6 = vrot.slane %v1072_v17, 7 }
 0x184   :  { %797 = vmatmul.msk.f32.gmra.mxu2 %vm236_vm8, %v355_v14  ;;  %v195_v13 = vsel %vm1016_vm3, 0.0, %v191_v12 }
 0x189   :  { %v343_v20 = vpop.permute.xlu0 %342 }
 0x18a   :  { %v356_v22 = vsel %vm219_vm6, %v352_v19, %v343_v20  ;;  %v1080_v24 = vpop.permute.xlu1 %166 }
 0x18b   :  { %v353_v26 = vsel %vm214_vm7, %v314_v25, %v1080_v24  ;;  %v188_v14 = vrot.slane %v1080_v24, 1  ;;  %v813_v25 = vld [vmem:[%s1406_s4 + $0x118] sm:$0xff] }
 0x18c   :  { %798 = vmatmul.msk.f32.gmra.mxu2 %vm236_vm8, %v356_v22  ;;  %v357_v28 = vsel %vm219_vm6, %v353_v26, %v345_v27  ;;  %v235_v22 = vld [vmem:[%s1406_s4 + $0x58] sm:$0xff]  ;;  %v234_v26 = vld [vmem:[%s1406_s4 + $0x50] sm:$0xff]  ;;  %527 = vmatpush.msra.mxu3 %v813_v25 }
 0x18d   :  { %v190_v18 = vsel %vm189_vm1, %v187_v10, %v188_v14  ;;  %v193_v19 = vsel %vm189_vm1, %v188_v14, %v185_v7  ;;  %253 = vmatpush.msrb.mxu1 %v235_v22  ;;  %v812_v27 = vld [vmem:[%s1406_s4 + $0x110] sm:$0xff] }
 0x18e   :  { %v197_v20 = vsel %vm1029_vm4, 0.0, %v193_v19  ;;  %528 = vmatpush.msra.mxu3 %v812_v27 }
 0x18f   :  { %254 = vmatpush.msrb.mxu1 %v234_v26 }
 0x194   :  { %799 = vmatmul.msk.f32.gmra.mxu2 %vm236_vm8, %v357_v28  ;;  %v233_v28 = vld [vmem:[%s1406_s4 + $0x48] sm:$0xff] }
 0x195   :  { %255 = vmatpush.msrb.mxu1 %v233_v28 }
 0x1e6   :  { %v400_v32 = vpop.f32.mrf.mxu2 }
 0x1e7   :  { %v417_v33 = vmul.f32 %v848_v29, %v400_v32  ;;  %v810_v32 = vld [vmem:[%s1406_s4 + $0x100] sm:$0xff] }
 0x1e9   :  { %v426_v34 = vadd.f32 %v849_v31, %v417_v33  ;;  %v231_v33 = vld [vmem:[%s1406_s4 + $0x38] sm:$0xff] }
 0x1eb   :  { %v430_v35 = vmax.f32 %v426_v34, 0.0  ;;  %v809_v34 = vld [vmem:[%s1406_s4 + $0xf8] sm:$0xff] }
 0x1ed   :  { %462 = vrot.lane.b32.xlu0 %v430_v35, %s884_s3  ;;  %v434_v40 = vrot.slane %v430_v35, 7  ;;  %v446_v42 = vrot.slane %v430_v35, 1  ;;  %v230_v35 = vld [vmem:[%s1406_s4 + $0x30] sm:$0xff] }
 0x207   :  { %v403_v36 = vpop.f32.mrf.mxu2 }
 0x208   :  { %v418_v37 = vmul.f32 %v848_v29, %v403_v36  ;;  %v808_v36 = vld [vmem:[%s1406_s4 + $0xf0] sm:$0xff] }
 0x20a   :  { %v427_v38 = vadd.f32 %v849_v31, %v418_v37  ;;  %v229_v37 = vld [vmem:[%s1406_s4 + $0x28] sm:$0xff] }
 0x20c   :  { %v431_v39 = vmax.f32 %v427_v38, 0.0  ;;  %v807_v38 = vld [vmem:[%s1406_s4 + $0xe8] sm:$0xff] }
 0x20e   :  { %v435_v41 = vrot.slane %v431_v39, 7  ;;  %464 = vrot.lane.b32.xlu2 %v431_v39, %s884_s3  ;;  %v447_v43 = vrot.slane %v431_v39, 1  ;;  %v228_v39 = vld [vmem:[%s1406_s4 + $0x20] sm:$0xff] }
 0x20f   :  { %v406_v44 = vpop.f32.mrf.mxu2 }
 0x210   :  { %v419_v45 = vmul.f32 %v848_v29, %v406_v44  ;;  %v452_v46 = vsel %vm189_vm1, %v446_v42, %v447_v43  ;;  %v1100_v47 = vsel %vm176_vm2, %v434_v40, %v435_v41  ;;  %v804_v44 = vld [vmem:[%s1406_s4 + $0xd0] sm:$0xff] }
 0x211   :  { %478 = vrot.lane.b32.xlu1 %v452_v46, %s883_s17  ;;  %v803_v46 = vld [vmem:[%s1406_s4 + $0xc8] sm:$0xff] }
 0x212   :  { %v428_v48 = vadd.f32 %v849_v31, %v419_v45  ;;  %v225_v45 = vld [vmem:[%s1406_s4 + $0x8] sm:$0xff] }
 0x214   :  { %v432_v49 = vmax.f32 %v428_v48, 0.0  ;;  %v224_v48 = vld [vmem:[%s1406_s4] sm:$0xff] }
 0x216   :  { %v436_v50 = vrot.slane %v432_v49, 7  ;;  %v448_v52 = vrot.slane %v432_v49, 1 }
 0x217   :  { %v409_v53 = vpop.f32.mrf.mxu2 }
 0x218   :  { %v420_v54 = vmul.f32 %v848_v29, %v409_v53  ;;  %v451_v55 = vsel %vm189_vm1, %v447_v43, %v448_v52  ;;  %v1107_v56 = vsel %vm176_vm2, %v435_v41, %v436_v50  ;;  %v811_v29 = vld [vmem:[%s1406_s4 + $0x108] sm:$0xff]  ;;  %v227_v41 = vld [vmem:[%s1406_s4 + $0x18] sm:$0xff]  ;;  %v226_v43 = vld [vmem:[%s1406_s4 + $0x10] sm:$0xff]  ;;  %v172_v53 = vrot.slane %v1047_v1, 7 }
 0x219   :  { %466 = vrot.lane.b32.xlu1 %v432_v49, %s884_s3  ;;  %v455_v57 = vsel %vm1016_vm3, 0.0, %v451_v55  ;;  %529 = vmatpush.msra.mxu3 %v811_v29  ;;  %v802_v49 = vld [vmem:[%s1406_s4 + $0xc0] sm:$0xff]  ;;  %v173_v1 = vrot.slane %v1062_v9, 7 }
 0x21a   :  { %v429_v59 = vadd.f32 %v849_v31, %v420_v54  ;;  %480 = vrot.lane.b32.xlu0 %v455_v57, %s883_s17  ;;  %v232_v31 = vld [vmem:[%s1406_s4 + $0x40] sm:$0xff] }
 0x21b   :  { %256 = vmatpush.msrb.mxu1 %v232_v31  ;;  %530 = vmatpush.msra.mxu3 %v810_v32  ;;  %v178_v14 = vsel %vm176_vm2, %v173_v1, %v174_v6 }
 0x21c   :  { %v433_v60 = vmax.f32 %v429_v59, 0.0 }
 0x21d   :  { %257 = vmatpush.msrb.mxu1 %v231_v33  ;;  %531 = vmatpush.msra.mxu3 %v809_v34 }
 0x21e   :  { %v437_v61 = vrot.slane %v433_v60, 7  ;;  %v449_v62 = vrot.slane %v433_v60, 1 }
 0x21f   :  { %258 = vmatpush.msrb.mxu1 %v230_v35  ;;  %532 = vmatpush.msra.mxu3 %v808_v36  ;;  %v850_v35 = vld [vmem:[%s1407_s5] ss:$0 sm:$0xff] }
 0x220   :  { %v450_v63 = vsel %vm189_vm1, %v448_v52, %v449_v62  ;;  %v453_v0 = vsel %vm189_vm1, %v449_v62, %v446_v42  ;;  %v1119_v2 = vsel %vm176_vm2, %v437_v61, %v434_v40  ;;  %v1123_v4 = vsel %vm176_vm2, %v436_v50, %v437_v61  ;;  %v806_v40 = vld [vmem:[%s1406_s4 + $0xe0] sm:$0xff]  ;;  %v805_v42 = vld [vmem:[%s1406_s4 + $0xd8] sm:$0xff] }
 0x221   :  { %482 = vrot.lane.b32.xlu2 %v450_v63, %s883_s17  ;;  %v457_v5 = vsel %vm1029_vm4, 0.0, %v453_v0  ;;  %259 = vmatpush.msrb.mxu1 %v229_v37  ;;  %v175_v52 = vrot.slane %v1080_v24, 7 }
 0x222   :  { %468 = vrot.lane.b32.xlu0 %v433_v60, %s884_s3  ;;  %484 = vrot.lane.b32.xlu1 %v457_v5, %s883_s17  ;;  %v442_v60 = vsel %vm1051_vm5, 0.0, %v1119_v2  ;;  %v179_v2 = vsel %vm176_vm2, %v172_v53, %v173_v1 }
 0x223   :  { %533 = vmatpush.msra.mxu3 %v807_v38  ;;  %260 = vmatpush.msrb.mxu1 %v228_v39  ;;  %v180_v55 = vsel %vm176_vm2, %v175_v52, %v172_v53  ;;  %v177_v28 = vsel %vm176_vm2, %v174_v6, %v175_v52  ;;  %v852_v39 = vld [vmem:[%s1407_s5 + $0x2] ss:$0 sm:$0xff]  ;;  %s885_s5 = smov [#allocation2]  }
 0x224   :  { %v181_v59 = vsel %vm1051_vm5, 0.0, %v180_v55  ;;  %v218_v32 = vsel %vm214_vm7, %v177_v28, %v968_v23 }
 0x225   :  { %534 = vmatpush.msra.mxu3 %v806_v40  ;;  %261 = vmatpush.msrb.mxu1 %v227_v41  ;;  %v215_v24 = vsel %vm214_vm7, %v181_v59, %v952_v11  ;;  %v853_v41 = vld [vmem:[%s1408_s6 + $0x2] ss:$0 sm:$0xff] }
 0x227   :  { %535 = vmatpush.msra.mxu3 %v805_v42  ;;  %262 = vmatpush.msrb.mxu1 %v226_v43 }
 0x229   :  { %202 = vrot.lane.b32.xlu2 %v192_v8, %s883_s17  ;;  %536 = vmatpush.msra.mxu3 %v804_v44  ;;  %v216_v8 = vsel %vm214_vm7, %v179_v2, %v958_v15 }
 0x22a   :  { %263 = vmatpush.msrb.mxu1 %v225_v45 }
 0x22b   :  { %537 = vmatpush.msra.mxu3 %v803_v46 }
 0x22c   :  { %264 = vmatpush.msrb.mxu1 %v224_v48 }
 0x22d   :  { %538 = vmatpush.msra.mxu3 %v802_v49 }
 0x231   :  { %204 = vrot.lane.b32.xlu2 %v195_v13, %s883_s17 }
 0x239   :  { %206 = vrot.lane.b32.xlu2 %v190_v18, %s883_s17  ;;  %v183_v18 = vsel %vm1067_vm9, 0.0, %v178_v14 }
 0x23a   :  { %v217_v22 = vsel %vm214_vm7, %v183_v18, %v962_v21 }
 0x241   :  { %208 = vrot.lane.b32.xlu2 %v197_v20, %s883_s17 }
 0x25f   :  { %v463_v57 = vpop.permute.xlu0 %462 }
 0x260   :  { %v490_v61 = vsel %vm214_vm7, %v442_v60, %v463_v57 }
 0x268   :  { %v465_v50 = vpop.permute.xlu2 %464 }
 0x269   :  { %v491_v9 = vsel %vm214_vm7, %v1100_v47, %v465_v50  ;;  %v444_v47 = vsel %vm1067_vm9, 0.0, %v1107_v56 }
 0x27b   :  { %v483_v54 = vpop.permute.xlu2 %482 }
 0x283   :  { %v203_v62 = vpop.permute.xlu2 %202  ;;  %v479_v63 = vpop.permute.xlu1 %478 }
 0x284   :  { %v220_v0 = vsel %vm219_vm6, %v215_v24, %v203_v62  ;;  %v494_v5 = vsel %vm219_vm6, %v490_v61, %v479_v63 }
 0x285   :  { %780 = vmatmul.msk.f32.vlgmr.msrb.gmra.mxu1 %vm236_vm8, %v220_v0  ;;  %814 = vmatmul.msk.f32.vlgmr.msra.gmra.mxu3 %vm236_vm8, %v494_v5 }
 0x28b   :  { %v205_v7 = vpop.permute.xlu2 %204  ;;  %v467_v17 = vpop.permute.xlu1 %466 }
 0x28c   :  { %v481_v10 = vpop.permute.xlu0 %480  ;;  %v221_v12 = vsel %vm219_vm6, %v216_v8, %v205_v7  ;;  %v492_v19 = vsel %vm214_vm7, %v444_v47, %v467_v17 }
 0x28d   :  { %781 = vmatmul.msk.f32.gmra.mxu1 %vm236_vm8, %v221_v12  ;;  %v495_v13 = vsel %vm219_vm6, %v491_v9, %v481_v10  ;;  %v496_v26 = vsel %vm219_vm6, %v492_v19, %v483_v54 }
 0x28e   :  { %815 = vmatmul.msk.f32.gmra.mxu3 %vm236_vm8, %v495_v13 }
 0x293   :  { %v207_v20 = vpop.permute.xlu2 %206 }
 0x294   :  { %v222_v25 = vsel %vm219_vm6, %v217_v22, %v207_v20  ;;  %v469_v27 = vpop.permute.xlu0 %468  ;;  %v485_v29 = vpop.permute.xlu1 %484 }
 0x295   :  { %782 = vmatmul.msk.f32.gmra.mxu1 %vm236_vm8, %v222_v25  ;;  %v493_v56 = vsel %vm214_vm7, %v1123_v4, %v469_v27  ;;  %v851_v4 = vld [vmem:[%s1408_s6] ss:$0 sm:$0xff] }
 0x296   :  { %816 = vmatmul.msk.f32.gmra.mxu3 %vm236_vm8, %v496_v26  ;;  %v497_v34 = vsel %vm219_vm6, %v493_v56, %v485_v29 }
 0x29b   :  { %v209_v31 = vpop.permute.xlu2 %208 }
 0x29c   :  { %v223_v33 = vsel %vm219_vm6, %v218_v32, %v209_v31 }
 0x29d   :  { %783 = vmatmul.msk.f32.gmra.mxu1 %vm236_vm8, %v223_v33  ;;  %v831_v33 = vld [vmem:[%s1406_s4 + $0x178] sm:$0xff] }
 0x29e   :  { %817 = vmatmul.msk.f32.gmra.mxu3 %vm236_vm8, %v497_v34  ;;  %v830_v34 = vld [vmem:[%s1406_s4 + $0x170] sm:$0xff]  ;;  %667 = vmatpush.msrb.mxu0 %v831_v33 }
 0x2a0   :  { %668 = vmatpush.msrb.mxu0 %v830_v34 }
 0x2a2   :  { %669 = vmatpush.msrb.mxu0 %v829_v30 }
 0x2a4   :  { %670 = vmatpush.msrb.mxu0 %v828_v58 }
 0x302   :  { %v266_v36 = vpop.f32.mrf.mxu1 }
 0x303   :  { %v282_v37 = vmul.f32 %v850_v35, %v266_v36  ;;  %v825_v36 = vld [vmem:[%s1406_s4 + $0x148] sm:$0xff] }
 0x305   :  { %v290_v38 = vadd.f32 %v851_v4, %v282_v37  ;;  %v824_v37 = vld [vmem:[%s1406_s4 + $0x140] sm:$0xff] }
 0x307   :  { %v294_v40 = vmax.f32 %v290_v38, 0.0  ;;  %v823_v38 = vld [vmem:[%s1406_s4 + $0x138] sm:$0xff] }
 0x308   :  { %v540_v42 = vpop.f32.mrf.mxu3 }
 0x309   :  { %v557_v43 = vmul.f32 %v852_v39, %v540_v42  ;;  %718 = vrot.lane.b32.xlu2 %v294_v40, %s884_s3  ;;  %v821_v40 = vld [vmem:[%s1406_s4 + $0x128] sm:$0xff] }
 0x30a   :  { %v269_v44 = vpop.f32.mrf.mxu1 }
 0x30b   :  { %v566_v45 = vadd.f32 %v853_v41, %v557_v43  ;;  %v283_v18 = vmul.f32 %v850_v35, %v269_v44 }
 0x30d   :  { %v570_v46 = vmax.f32 %v566_v45, 0.0  ;;  %v291_v22 = vadd.f32 %v851_v4, %v283_v18 }
 0x30f   :  { %602 = vrot.lane.b32.xlu0 %v570_v46, %s884_s3  ;;  %v574_v54 = vrot.slane %v570_v46, 7  ;;  %v586_v57 = vrot.slane %v570_v46, 1  ;;  %v295_v27 = vmax.f32 %v291_v22, 0.0 }
 0x311   :  { %v543_v48 = vpop.f32.mrf.mxu3 }
 0x312   :  { %v558_v49 = vmul.f32 %v852_v39, %v543_v48  ;;  %v272_v50 = vpop.f32.mrf.mxu1 }
 0x313   :  { %v284_v56 = vmul.f32 %v850_v35, %v272_v50 }
 0x314   :  { %v567_v52 = vadd.f32 %v853_v41, %v558_v49 }
 0x315   :  { %v292_v31 = vadd.f32 %v851_v4, %v284_v56 }
 0x316   :  { %v571_v53 = vmax.f32 %v567_v52, 0.0 }
 0x317   :  { %v296_v32 = vmax.f32 %v292_v31, 0.0 }
 0x318   :  { %v575_v55 = vrot.slane %v571_v53, 7  ;;  %604 = vrot.lane.b32.xlu0 %v571_v53, %s884_s3  ;;  %v587_v59 = vrot.slane %v571_v53, 1 }
 0x319   :  { %v546_v60 = vpop.f32.mrf.mxu3 }
 0x31a   :  { %v559_v61 = vmul.f32 %v852_v39, %v546_v60  ;;  %v275_v62 = vpop.f32.mrf.mxu1  ;;  %v592_v24 = vsel %vm189_vm1, %v586_v57, %v587_v59  ;;  %v1293_v63 = vsel %vm176_vm2, %v574_v54, %v575_v55 }
 0x31b   :  { %v285_v1 = vmul.f32 %v850_v35, %v275_v62  ;;  %618 = vrot.lane.b32.xlu1 %v592_v24, %s883_s17  ;;  %v827_v35 = vld [vmem:[%s1406_s4 + $0x158] sm:$0xff]  ;;  %v855_v24 = vld [vmem:[%s1408_s6 + $0x3] ss:$0 sm:$0xff]  ;;  %s762_s6 = sshll.u32 %s885_s5, 4  ;;  %s763_s6 = int_to_ptr.vmem [resolvable:$true] %s762_s6 }
 0x31c   :  { %v568_v0 = vadd.f32 %v853_v41, %v559_v61  ;;  %671 = vmatpush.msrb.mxu0 %v827_v35 }
 0x31d   :  { %v293_v5 = vadd.f32 %v851_v4, %v285_v1  ;;  %v826_v4 = vld [vmem:[%s1406_s4 + $0x150] sm:$0xff] }
 0x31e   :  { %v572_v2 = vmax.f32 %v568_v0, 0.0  ;;  %672 = vmatpush.msrb.mxu0 %v826_v4 }
 0x31f   :  { %v297_v6 = vmax.f32 %v293_v5, 0.0 }
 0x320   :  { %v576_v7 = vrot.slane %v572_v2, 7  ;;  %606 = vrot.lane.b32.xlu0 %v572_v2, %s884_s3  ;;  %v588_v8 = vrot.slane %v572_v2, 1  ;;  %673 = vmatpush.msrb.mxu0 %v825_v36 }
 0x321   :  { %724 = vrot.lane.b32.xlu2 %v297_v6, %s884_s3  ;;  %v549_v9 = vpop.f32.mrf.mxu3 }
 0x322   :  { %v560_v10 = vmul.f32 %v852_v39, %v549_v9  ;;  %v591_v12 = vsel %vm189_vm1, %v587_v59, %v588_v8  ;;  %v579_v13 = vsel %vm176_vm2, %v575_v55, %v576_v7  ;;  %674 = vmatpush.msrb.mxu0 %v824_v37  ;;  %v822_v39 = vld [vmem:[%s1406_s4 + $0x130] sm:$0xff] }
 0x323   :  { %v595_v14 = vsel %vm1016_vm3, 0.0, %v591_v12  ;;  %v584_v3 = vsel %vm1067_vm9, 0.0, %v579_v13 }
 0x324   :  { %v569_v17 = vadd.f32 %v853_v41, %v560_v10  ;;  %620 = vrot.lane.b32.xlu1 %v595_v14, %s883_s17  ;;  %675 = vmatpush.msrb.mxu0 %v823_v38  ;;  %v820_v41 = vld [vmem:[%s1406_s4 + $0x120] sm:$0xff] }
 0x326   :  { %v573_v47 = vmax.f32 %v569_v17, 0.0  ;;  %676 = vmatpush.msrb.mxu0 %v822_v39 }
 0x328   :  { %v577_v19 = vrot.slane %v573_v47, 7  ;;  %608 = vrot.lane.b32.xlu0 %v573_v47, %s884_s3  ;;  %v589_v20 = vrot.slane %v573_v47, 1  ;;  %677 = vmatpush.msrb.mxu0 %v821_v40 }
 0x32a   :  { %v590_v25 = vsel %vm189_vm1, %v588_v8, %v589_v20  ;;  %v581_v26 = vsel %vm176_vm2, %v577_v19, %v574_v54  ;;  %v578_v51 = vsel %vm176_vm2, %v576_v7, %v577_v19  ;;  %v593_v28 = vsel %vm189_vm1, %v589_v20, %v586_v57  ;;  %678 = vmatpush.msrb.mxu0 %v820_v41 }
 0x32b   :  { %v597_v29 = vsel %vm1029_vm4, 0.0, %v593_v28  ;;  %v582_v43 = vsel %vm1051_vm5, 0.0, %v581_v26 }
 0x32c   :  { %622 = vrot.lane.b32.xlu1 %v590_v25, %s883_s17 }
 0x330   :  { %720 = vrot.lane.b32.xlu0 %v295_v27, %s884_s3 }
 0x334   :  { %624 = vrot.lane.b32.xlu1 %v597_v29, %s883_s17 }
 0x33c   :  { %722 = vrot.lane.b32.xlu1 %v296_v32, %s884_s3 }
 0x363   :  { %v719_v19 = vpop.permute.xlu2 %718 }
 0x364   :  { %v746_v28 = vsel %vm214_vm7, %v952_v11, %v719_v19 }
 0x37b   :  { %v725_v20 = vpop.permute.xlu2 %724 }
 0x37c   :  { %v749_v11 = vsel %vm214_vm7, %v968_v23, %v725_v20 }
 0x381   :  { %v603_v42 = vpop.permute.xlu0 %602 }
 0x382   :  { %v630_v44 = vsel %vm214_vm7, %v582_v43, %v603_v42 }
 0x38a   :  { %v605_v48 = vpop.permute.xlu0 %604 }
 0x38b   :  { %v631_v49 = vsel %vm214_vm7, %v1293_v63, %v605_v48 }
 0x38d   :  { %v619_v45 = vpop.permute.xlu1 %618 }
 0x38e   :  { %v634_v46 = vsel %vm219_vm6, %v630_v44, %v619_v45 }
 0x38f   :  { %832 = vmatmul.msk.f32.vlgmr.msrb.gmra.mxu0 %vm236_vm8, %v634_v46 }
 0x392   :  { %v607_v53 = vpop.permute.xlu0 %606 }
 0x393   :  { %v632_v54 = vsel %vm214_vm7, %v584_v3, %v607_v53 }
 0x396   :  { %v621_v50 = vpop.permute.xlu1 %620 }
 0x397   :  { %v635_v52 = vsel %vm219_vm6, %v631_v49, %v621_v50 }
 0x398   :  { %833 = vmatmul.msk.f32.gmra.mxu0 %vm236_vm8, %v635_v52 }
 0x39a   :  { %v609_v59 = vpop.permute.xlu0 %608 }
 0x39b   :  { %v633_v60 = vsel %vm214_vm7, %v578_v51, %v609_v59 }
 0x39e   :  { %v623_v55 = vpop.permute.xlu1 %622 }
 0x39f   :  { %v636_v57 = vsel %vm219_vm6, %v632_v54, %v623_v55 }
 0x3a0   :  { %834 = vmatmul.msk.f32.gmra.mxu0 %vm236_vm8, %v636_v57 }
 0x3a2   :  { %v721_v25 = vpop.permute.xlu0 %720 }
 0x3a3   :  { %v747_v31 = vsel %vm214_vm7, %v958_v15, %v721_v25 }
 0x3a6   :  { %v625_v61 = vpop.permute.xlu1 %624 }
 0x3a7   :  { %v637_v62 = vsel %vm219_vm6, %v633_v60, %v625_v61 }
 0x3a8   :  { %835 = vmatmul.msk.f32.gmra.mxu0 %vm236_vm8, %v637_v62 }
 0x3ae   :  { %v723_v22 = vpop.permute.xlu1 %722 }
 0x3af   :  { %v748_v26 = vsel %vm214_vm7, %v962_v21, %v723_v22 }
 0x40c   :  { %v680_v63 = vpop.f32.mrf.mxu0 }
 0x40d   :  { %v697_v1 = vmul.f32 %v854_v16, %v680_v63 }
 0x40f   :  { %v706_v0 = vadd.f32 %v855_v24, %v697_v1 }
 0x411   :  { %v710_v5 = vmax.f32 %v706_v0, 0.0 }
 0x413   :  { %734 = vrot.lane.b32.xlu0 %v710_v5, %s883_s17 }
 0x415   :  { %v683_v2 = vpop.f32.mrf.mxu0 }
 0x416   :  { %v698_v6 = vmul.f32 %v854_v16, %v683_v2 }
 0x418   :  { %v707_v7 = vadd.f32 %v855_v24, %v698_v6 }
 0x41a   :  { %v711_v8 = vmax.f32 %v707_v7, 0.0 }
 0x41c   :  { %736 = vrot.lane.b32.xlu1 %v711_v8, %s883_s17 }
 0x41d   :  { %v686_v9 = vpop.f32.mrf.mxu0 }
 0x41e   :  { %v699_v10 = vmul.f32 %v854_v16, %v686_v9 }
 0x420   :  { %v708_v12 = vadd.f32 %v855_v24, %v699_v10 }
 0x422   :  { %v712_v13 = vmax.f32 %v708_v12, 0.0 }
 0x424   :  { %738 = vrot.lane.b32.xlu2 %v712_v13, %s883_s17 }
 0x425   :  { %v689_v14 = vpop.f32.mrf.mxu0 }
 0x426   :  { %v700_v17 = vmul.f32 %v854_v16, %v689_v14 }
 0x428   :  { %v709_v18 = vadd.f32 %v855_v24, %v700_v17 }
 0x42a   :  { %v713_v47 = vmax.f32 %v709_v18, 0.0 }
 0x42c   :  { %740 = vrot.lane.b32.xlu0 %v713_v47, %s883_s17 }
 0x47e   :  { %v739_v51 = vpop.permute.xlu2 %738 }
 0x47f   :  { %v752_v27 = vsel %vm219_vm6, %v748_v26, %v739_v51 }
 0x480   :  { %756 = vst.msk [vmem:[#allocation2 + $0x10] sm:$0xff] %vm236_vm8, %v752_v27 }
 0x485   :  { %v735_v56 = vpop.permute.xlu0 %734 }
 0x486   :  { %v750_v29 = vsel %vm219_vm6, %v746_v28, %v735_v56 }
 0x487   :  { %754 = vst.msk [vmem:[#allocation2] sm:$0xff] %vm236_vm8, %v750_v29 }
 0x48e   :  { %v737_v32 = vpop.permute.xlu1 %736 }
 0x48f   :  { %v751_v33 = vsel %vm219_vm6, %v747_v31, %v737_v32 }
 0x490   :  { %755 = vst.msk [vmem:[#allocation2 + $0x8] sm:$0xff] %vm236_vm8, %v751_v33 }
 0x49e   :  { %v741_v21 = vpop.permute.xlu0 %740 }
 0x49f   :  { %v753_v34 = vsel %vm219_vm6, %v749_v11, %v741_v21 }
 0x4a0   :  { %757 = vst.msk [vmem:[#allocation2 + $0x18] sm:$0xff] %vm236_vm8, %v753_v34 }
 0x4a1   :  { %770 = dma.vmem_to_hbm [thread:$0]  %s763_s6, 512, %s765_s26, [#allocation3], %s886_s27, %s886_s27, %s887_s28  }
 0x4a2   :  { %880 = dma.done.wait [#allocation3], 512  }
 0x4a3   :  { %881 = vsyncadd [#allocation3], 4294966784 }
 0x4a4   :  { %775 = vsyncpa [#allocation3], 1 }

</bundles_post_ra>
